<compile_context>
chip_gen: v7x
topology: tpu7x:2x2x1
jax: 0.10.0
libtpu: 0.0.40
codegen_flags: <defaults>
</compile_context>

<pallas_src>
import jax
import jax.numpy as jnp
from jax.experimental import pallas as pl
from jax.experimental.pallas import tpu as pltpu

LANE = 128
SUBLANE = 8
NEG_BIG = -1e30  # masks padded classes out of the softmax


def _round_up(n, m):
    return (n + m - 1) // m * m


def _fcn_kernel(x_ref, w_ref, b_ref, o_ref):
    # x: (TB, D_in) in its native dtype (f32), w: (D_in, 128) bf16,
    # b: (1, 128) f32. Cast x -> bf16 in VMEM (free VPU work) for the MXU.
    x_bf = x_ref[...].astype(jnp.bfloat16)
    logits = jnp.dot(x_bf, w_ref[...],
                     preferred_element_type=jnp.float32) + b_ref[...]
    # Numerically-stable log_softmax along the class axis. Padded classes have
    # logits ~ -1e30, so exp(shifted) underflows to 0 and they contribute
    # nothing to the log-sum-exp. Per-row math only -> ragged-tile safe.
    m = jnp.max(logits, axis=1, keepdims=True)
    shifted = logits - m
    lse = jnp.log(jnp.sum(jnp.exp(shifted), axis=1, keepdims=True))
    o_ref[...] = (shifted - lse).astype(o_ref.dtype)


def prepare_fcn_params(weight, bias):
    """One-time prep: transpose + bf16-cast weight, lane-pad classes to 128.

    weight: (output_size, input_size) as in nn.Linear; bias: (output_size,).
    Returns (w_padded (input_size, 128) bf16, b_padded (1, 128) f32).
    """
    output_size, input_size = weight.shape
    n_pad = _round_up(output_size, LANE)
    w_t = jnp.zeros((input_size, n_pad), jnp.bfloat16)
    w_t = w_t.at[:, :output_size].set(weight.T.astype(jnp.bfloat16))
    b_p = jnp.full((1, n_pad), NEG_BIG, jnp.float32)
    b_p = b_p.at[0, :output_size].set(bias.astype(jnp.float32))
    return w_t, b_p


def fcn_forward(x, w_padded, b_padded, input_size, output_size,
                tile_b=2048, out_dtype=jnp.float32):
    """x: anything reshapable to (-1, input_size). Returns (B, output_size)."""
    x2d = x.reshape(-1, input_size)
    B = x2d.shape[0]
    n_pad = w_padded.shape[1]

    # Batch tile: multiple of 8 sublanes. Base it on cdiv(B, 2) so mid-size
    # batches produce >=2 grid steps (both v7x TensorCores busy), capped at
    # tile_b to stay inside the 32 MiB scoped-VMEM default everywhere.
    tb = min(tile_b, max(SUBLANE, _round_up(pl.cdiv(B, 2), SUBLANE)))
    grid = (pl.cdiv(B, tb),)  # ragged last tile: no host-side batch pad

    cost = pl.CostEstimate(
        flops=2 * B * input_size * n_pad,
        transcendentals=B * n_pad,
        bytes_accessed=(B * input_size * x2d.dtype.itemsize   # x (native dtype)
                        + input_size * n_pad * 2              # W (bf16)
                        + n_pad * 4                           # bias
                        + B * n_pad * jnp.dtype(out_dtype).itemsize))  # out

    out = pl.pallas_call(
        _fcn_kernel,
        out_shape=jax.ShapeDtypeStruct((B, n_pad), out_dtype),
        grid=grid,
        in_specs=[
            pl.BlockSpec((tb, input_size), lambda i: (i, 0)),       # x tile
            pl.BlockSpec((input_size, n_pad), lambda i: (0, 0)),    # W resident
            pl.BlockSpec((1, n_pad), lambda i: (0, 0)),             # b resident
        ],
        out_specs=pl.BlockSpec((tb, n_pad), lambda i: (i, 0)),
        compiler_params=pltpu.CompilerParams(
            dimension_semantics=("parallel",)),
        cost_estimate=cost,
    )(x2d, w_padded, b_padded)

    # Only the class-column slice remains on the wrapper side; a fused
    # downstream consumer can instead take the padded (B, 128) array directly.
    return out[:, :output_size]


if __name__ == "__main__":
    input_size = 784
    output_size = 10
    batch = 2

    key = jax.random.PRNGKey(0)
    k_x, k_w, k_b = jax.random.split(key, 3)

    # Deterministic synthetic parameters (PyTorch nn.Linear-style uniform init).
    bound = 1.0 / (input_size ** 0.5)
    weight = jax.random.uniform(
        k_w, (output_size, input_size), jnp.float32, -bound, bound)
    bias = jax.random.uniform(
        k_b, (output_size,), jnp.float32, -bound, bound)

    # Example input in NCHW (MNIST-like), flattened inside the wrapper.
    x = jax.random.normal(k_x, (batch, 1, 28, 28), jnp.float32)

    # Param prep once (hoisted out of the per-call path).
    w_padded, b_padded = prepare_fcn_params(weight, bias)

    out = fcn_forward(x, w_padded, b_padded, input_size, output_size)
    out = jax.block_until_ready(out)

    # Reference with the same bf16 operand rounding (f32 accumulation).
    x_bf = x.reshape(-1, input_size).astype(jnp.bfloat16).astype(jnp.float32)
    w_bf = weight.astype(jnp.bfloat16).astype(jnp.float32)
    ref = jax.nn.log_softmax(x_bf @ w_bf.T + bias, axis=1)

    assert out.shape == (batch, output_size)
    assert jnp.allclose(out, ref, atol=2e-3, rtol=2e-3)

    print("KERNEL_OK")
</pallas_src>

<mosaic_0001>
module attributes {stable_mosaic.version = 11 : i64} {
  func.func @_fcn_kernel(%arg0: i32, %arg1: memref<8x784xf32, #tpu.memory_space<vmem>>, %arg2: memref<784x128xbf16, #tpu.memory_space<vmem>>, %arg3: memref<1x128xf32, #tpu.memory_space<vmem>>, %arg4: memref<8x128xf32, #tpu.memory_space<vmem>>) attributes {dimension_semantics = [#tpu.dimension_semantics<parallel>], iteration_bounds = array<i64: 1>, scalar_prefetch = 0 : i64, scratch_operands = 0 : i64, tpu.core_type = #tpu.core_type<tc>, window_params = [{transform_indices = @transform_0, window_bounds = array<i64: 8, 784>}, {pipeline_mode = #tpu.pipeline_mode<synchronous>, transform_indices = @transform_1, window_bounds = array<i64: 784, 128>}, {pipeline_mode = #tpu.pipeline_mode<synchronous>, transform_indices = @transform_2, window_bounds = array<i64: 1, 128>}, {transform_indices = @transform_3, window_bounds = array<i64: 8, 128>}]} {
    %c0 = arith.constant 0 : index
    %c0_0 = arith.constant 0 : index
    %0 = vector.load %arg1[%c0, %c0_0] : memref<8x784xf32, #tpu.memory_space<vmem>>, vector<8x784xf32>
    %1 = arith.truncf %0 : vector<8x784xf32> to vector<8x784xbf16>
    %c0_1 = arith.constant 0 : index
    %c0_2 = arith.constant 0 : index
    %2 = vector.load %arg2[%c0_1, %c0_2] : memref<784x128xbf16, #tpu.memory_space<vmem>>, vector<784x128xbf16>
    %cst = arith.constant dense<0.000000e+00> : vector<8x128xf32>
    %3 = tpu.matmul %1, %2, %cst {dimension_numbers = #tpu.dot_dimension_numbers<[1], [0], [0], [1], [0, 0, 1, 1], [], []>} : vector<8x784xbf16>, vector<784x128xbf16>, vector<8x128xf32> -> vector<8x128xf32>
    %c0_3 = arith.constant 0 : index
    %c0_4 = arith.constant 0 : index
    %4 = vector.load %arg3[%c0_3, %c0_4] : memref<1x128xf32, #tpu.memory_space<vmem>>, vector<1x128xf32>
    %5 = vector.broadcast %4 : vector<1x128xf32> to vector<8x128xf32>
    %6 = arith.addf %3, %5 : vector<8x128xf32>
    %cst_5 = arith.constant dense<0xFF800000> : vector<8xf32>
    %7 = vector.multi_reduction <maximumf>, %6, %cst_5 [1] : vector<8x128xf32> to vector<8xf32>
    %8 = vector.shape_cast %7 : vector<8xf32> to vector<8x1xf32>
    %9 = vector.broadcast %8 : vector<8x1xf32> to vector<8x128xf32>
    %10 = arith.subf %6, %9 : vector<8x128xf32>
    %11 = math.exp %10 : vector<8x128xf32>
    %cst_6 = arith.constant dense<0.000000e+00> : vector<8xf32>
    %12 = vector.multi_reduction <add>, %11, %cst_6 [1] : vector<8x128xf32> to vector<8xf32>
    %13 = vector.shape_cast %12 : vector<8xf32> to vector<8x1xf32>
    %14 = math.log %13 : vector<8x1xf32>
    %15 = vector.broadcast %14 : vector<8x1xf32> to vector<8x128xf32>
    %16 = arith.subf %10, %15 : vector<8x128xf32>
    %c0_7 = arith.constant 0 : index
    %c0_8 = arith.constant 0 : index
    %17 = vector.load %arg4[%c0_7, %c0_8] : memref<8x128xf32, #tpu.memory_space<vmem>>, vector<8x128xf32>
    tpu.vector_store %arg4[%c0_7, %c0_8], %16 {strides = array<i32>} : memref<8x128xf32, #tpu.memory_space<vmem>>, vector<8x128xf32>,
    return
  }
  func.func @transform_0(%arg0: i32) -> (i32, i32) {
    %c0_i32 = arith.constant 0 : i32
    %c0_i32_0 = arith.constant 0 : i32
    return %arg0, %c0_i32 : i32, i32
  }
  func.func @transform_1(%arg0: i32) -> (i32, i32) {
    %c0_i32 = arith.constant 0 : i32
    %c0_i32_0 = arith.constant 0 : i32
    %c0_i32_1 = arith.constant 0 : i32
    return %c0_i32, %c0_i32_0 : i32, i32
  }
  func.func @transform_2(%arg0: i32) -> (i32, i32) {
    %c0_i32 = arith.constant 0 : i32
    %c0_i32_0 = arith.constant 0 : i32
    %c0_i32_1 = arith.constant 0 : i32
    return %c0_i32, %c0_i32_0 : i32, i32
  }
  func.func @transform_3(%arg0: i32) -> (i32, i32) {
    %c0_i32 = arith.constant 0 : i32
    %c0_i32_0 = arith.constant 0 : i32
    return %arg0, %c0_i32 : i32, i32
  }
}

</mosaic_0001>

<bundles_post_ra>
// kernel: tpu_custom_call.1
= control target key start
LH: loop header
LB: loop body
LE: loop exit
PB: predicated region body
PF: predicated region fallthrough
CT: control target
= control target key end

     0   :  { %8 = vsyncpa [#allocation3], 0  ;;  %s1092_s0 = inlined_call_operand.hbm [shape: f32[2,784], index: 0, kind: input, shape index: {}]   ;;  %s1093_s1 = inlined_call_operand.hbm [shape: bf16[784,128], index: 1, kind: input, shape index: {}]   ;;  %s1094_s2 = inlined_call_operand.vmem [shape: f32[1,128], index: 2, kind: input, shape index: {}]   ;;  %s1095_s3 = inlined_call_operand.hbm [shape: f32[2,128], index: 3, kind: output, shape index: {}]  }
   0x1   :  { %9 = vsyncpa [#allocation6], 0 }
   0x2   :  { %10 = vsyncpa [#allocation4], 0 }
   0x3   :  { %15 = vsyncadd [#allocation3], 672  ;;  %s1011_s12 = smov [#allocation2]   ;;  %s939_s16 = scalar_lea.hbm %s1092_s0, 224 }
   0x4   :  { %s16_s13 = sshll.u32 %s1011_s12, 4  ;;  %p940_p0 = scmp.ne.s32.totalorder %s1092_s0, %s939_s16  ;;  %s17_s13 = int_to_ptr.vmem [resolvable:$true] %s16_s13 }
   0x5   :  { %p943_p1 = scmp.lt.u32.totalorder %s939_s16, %s1092_s0 }
   0x7   :  { %p945_p2 = pnand %p943_p1, %p940_p0 }
   0x9   :  { %948 = shalt.err (!%p945_p2)
}
   0xa   :  { %s949_s21 = scalar_lea.vmem %s17_s13, 224  ;;  %s953_s22 = scalar_lea.vmem %s17_s13, 896 }
   0xb   :  { %p950_p3 = scmp.ne.s32.totalorder %s17_s13, %s949_s21  ;;  %p954_p4 = scmp.lt.s32.totalorder %s17_s13, %s17_s13 }
   0xc   :  { %p955_p5 = scmp.lt.s32.totalorder %s953_s22, %s949_s21 }
   0xe   :  { %p956_p6 = por %p955_p5, %p954_p4 }
  0x10   :  { %p957_p7 = pnand %p956_p6, %p950_p3 }
  0x12   :  { %960 = shalt.err (!%p957_p7)
}
  0x13   :  { %s1012_s23 = smov 224   ;;  %s1013_s24 = smov 14  }
  0x14   :  { %22 = dma.hbm_to_vmem [thread:$0]  %s1092_s0, 224, %s17_s13, [#allocation3], %s1012_s23, %s1012_s23, %s1013_s24  }
  0x15   :  { %s1014_s27 = smov [#allocation5]   ;;  %s961_s4 = scalar_lea.hbm %s1093_s1, 6272 }
  0x16   :  { %s28_s28 = sshll.u32 %s1014_s27, 4  ;;  %p962_p8 = scmp.ne.s32.totalorder %s1093_s1, %s961_s4  ;;  %s29_s28 = int_to_ptr.vmem [resolvable:$true] %s28_s28 }
  0x17   :  { %p965_p9 = scmp.lt.u32.totalorder %s961_s4, %s1093_s1 }
  0x19   :  { %p967_p10 = pnand %p965_p9, %p962_p8 }
  0x1b   :  { %970 = shalt.err (!%p967_p10)
}
  0x1c   :  { %s971_s9 = scalar_lea.vmem %s29_s28, 6272  ;;  %p976_p12 = scmp.lt.s32.totalorder %s29_s28, %s29_s28 }
  0x1d   :  { %p972_p11 = scmp.ne.s32.totalorder %s29_s28, %s971_s9  ;;  %p977_p13 = scmp.lt.s32.totalorder %s971_s9, %s971_s9 }
  0x1f   :  { %p978_p0 = por %p977_p13, %p976_p12 }
  0x21   :  { %p979_p1 = pnand %p978_p0, %p972_p11 }
  0x23   :  { %982 = shalt.err (!%p979_p1)
}
  0x24   :  { %s1015_s0 = smov 64   ;;  %s1016_s10 = smov 4  }
  0x25   :  { %34 = dma.hbm_to_vmem [thread:$0]  %s1093_s1, 6272, %s29_s28, [#allocation6], %s1015_s0, %s1015_s0, %s1016_s10  }
  0x26   :  { %1005 = dma.done.wait [#allocation3], 896  }
  0x27   :  { %1006 = vsyncadd [#allocation3], 4294966400 }
  0x28   :  { %1007 = dma.done.wait [#allocation6], 6272  }
  0x29   :  { %1008 = vsyncadd [#allocation6], 4294961024  ;;  %v874_v0 = vld [vmem:[#allocation5 + $0x40] sm:$0xff]   ;;  %v878_v4 = vld [vmem:[#allocation5 + $0x48] sm:$0xff]   ;;  %v1017_v23 = vmov 1983009808   ;;  %v67_v25 = vlaneseq }
  0x2a   :  { %v875_v1 = vld [vmem:[#allocation5] sm:$0xff]   ;;  %788 = vmatprep.subr.bf16.mxu0 %v874_v0  ;;  %v879_v5 = vld [vmem:[#allocation5 + $0x8] sm:$0xff]   ;;  %v882_v8 = vld [vmem:[#allocation5 + $0x50] sm:$0xff]   ;;  %v65_v24 = vunpack.c.l.s4 %v1017_v23  ;;  %v1018_v47 = vmov 0.0   ;;  %vm1019_vm0 = vmmov 0   ;;  %vm544_vm1 = vcmask 130048  }
  0x2b   :  { %v876_v2 = vld [vmem:[#allocation5 + $0xc0] sm:$0xff]   ;;  %789 = vmatpush3.bf16.msra.mxu0 %v875_v1  ;;  %v880_v6 = vld [vmem:[#allocation5 + $0xc8] sm:$0xff]   ;;  %v883_v9 = vld [vmem:[#allocation5 + $0x10] sm:$0xff]   ;;  %v68_v31 = vshrl.u32 %v67_v25, 7 }
  0x2c   :  { %v877_v3 = vld [vmem:[#allocation5 + $0x80] sm:$0xff]   ;;  %810 = vmatprep.subr.bf16.mxu1 %v876_v2  ;;  %790 = vmatprep.subr.bf16.mxu0 %v878_v4  ;;  %v881_v7 = vld [vmem:[#allocation5 + $0x88] sm:$0xff]   ;;  %v884_v10 = vld [vmem:[#allocation5 + $0xd0] sm:$0xff]   ;;  %v66_v30 = vunpack.c.0.s8 %v65_v24 }
  0x2d   :  { %811 = vmatpush3.bf16.msra.mxu1 %v877_v3  ;;  %v885_v11 = vld [vmem:[#allocation5 + $0x90] sm:$0xff]   ;;  %v886_v12 = vld [vmem:[#allocation5 + $0x58] sm:$0xff]   ;;  %v890_v16 = vld [vmem:[#allocation5 + $0x60] sm:$0xff]  }
  0x2e   :  { %812 = vmatprep.subr.bf16.mxu1 %v880_v6  ;;  %v887_v13 = vld [vmem:[#allocation5 + $0x18] sm:$0xff]   ;;  %v891_v17 = vld [vmem:[#allocation5 + $0x20] sm:$0xff]   ;;  %v894_v20 = vld [vmem:[#allocation5 + $0x68] sm:$0xff]   ;;  %v1067_v36 = vsub.s32 %v66_v30, %v68_v31 }
  0x2f   :  { %791 = vmatpush3.bf16.msra.mxu0 %v879_v5  ;;  %v888_v14 = vld [vmem:[#allocation5 + $0xd8] sm:$0xff]   ;;  %v892_v18 = vld [vmem:[#allocation5 + $0xe0] sm:$0xff]   ;;  %v895_v21 = vld [vmem:[#allocation5 + $0x28] sm:$0xff]  }
  0x30   :  { %792 = vmatprep.subr.bf16.mxu0 %v882_v8  ;;  %v889_v15 = vld [vmem:[#allocation5 + $0x98] sm:$0xff]   ;;  %v893_v19 = vld [vmem:[#allocation5 + $0xa0] sm:$0xff]   ;;  %v896_v22 = vld [vmem:[#allocation5 + $0xe8] sm:$0xff]  }
  0x31   :  { %813 = vmatpush3.bf16.msra.mxu1 %v881_v7  ;;  %v897_v26 = vld [vmem:[#allocation5 + $0xa8] sm:$0xff]   ;;  %v898_v27 = vld [vmem:[#allocation5 + $0x70] sm:$0xff]   ;;  %v902_v33 = vld [vmem:[#allocation5 + $0x78] sm:$0xff]  }
  0x32   :  { %814 = vmatprep.subr.bf16.mxu1 %v884_v10  ;;  %v899_v28 = vld [vmem:[#allocation5 + $0x30] sm:$0xff]   ;;  %v903_v34 = vld [vmem:[#allocation5 + $0x38] sm:$0xff]   ;;  %v910_v42 = vld [vmem:[#allocation5 + $0x140] sm:$0xff]  }
  0x33   :  { %793 = vmatpush3.bf16.msra.mxu0 %v883_v9  ;;  %v900_v29 = vld [vmem:[#allocation5 + $0xf0] sm:$0xff]   ;;  %v904_v35 = vld [vmem:[#allocation5 + $0xf8] sm:$0xff]   ;;  %v913_v52 = vld [vmem:[#allocation5 + $0x100] sm:$0xff]  }
  0x34   :  { %794 = vmatprep.subr.bf16.mxu0 %v886_v12  ;;  %v901_v32 = vld [vmem:[#allocation5 + $0xb0] sm:$0xff]   ;;  %v909_v39 = vld [vmem:[#allocation5 + $0xb8] sm:$0xff]   ;;  %v914_v55 = vld [vmem:[#allocation5 + $0x148] sm:$0xff]  }
  0x35   :  { %815 = vmatpush3.bf16.msra.mxu1 %v885_v11  ;;  %v905_v37 = vld [vmem:[#allocation2] ss:$14 sps:$4 sm:$0xff]   ;;  %v907_v38 = vld [vmem:[#allocation2 + $0x1c] ss:$14 sps:$4 sm:$0xff]   ;;  %v911_v43 = vld [vmem:[#allocation2 + $0x4] ss:$14 sps:$4 sm:$0xff]  }
  0x36   :  { %816 = vmatprep.subr.bf16.mxu1 %v888_v14  ;;  %v70_v40 = vrot.slane %v905_v37, %v1067_v36  ;;  %v84_v41 = vrot.slane %v907_v38, %v1067_v36  ;;  %v912_v44 = vld [vmem:[#allocation2 + $0x20] ss:$14 sps:$4 sm:$0xff]   ;;  %v77_v48 = vrot.slane %v911_v43, %v1067_v36  ;;  %v920_v63 = vld [vmem:[#allocation5 + $0x160] sm:$0xff]   ;;  %v932_v4 = vld [vmem:[#allocation2 + $0x24] ss:$14 sps:$4 sm:$0xff]  }
  0x37   :  { %795 = vmatpush3.bf16.msra.mxu0 %v887_v13  ;;  %v91_v49 = vrot.slane %v912_v44, %v1067_v36  ;;  %v915_v58 = vld [vmem:[#allocation5 + $0x108] sm:$0xff]   ;;  %v916_v59 = vld [vmem:[#allocation5 + $0x150] sm:$0xff]   ;;  %v918_v61 = vld [vmem:[#allocation5 + $0x158] sm:$0xff]   ;;  %v120_v9 = vrot.slane %v932_v4, %v1067_v36 }
  0x38   :  { %796 = vmatprep.subr.bf16.mxu0 %v890_v16  ;;  %v93_v45 = vcombine.high %v70_v40, %v84_v41  ;;  %v92_v46 = vcombine.low %v70_v40, %v84_v41  ;;  %v917_v60 = vld [vmem:[#allocation5 + $0x110] sm:$0xff]   ;;  %v919_v62 = vld [vmem:[#allocation5 + $0x118] sm:$0xff]   ;;  %v928_v0 = vld [vmem:[#allocation5 + $0x180] sm:$0xff]  }
  0x39   :  { %817 = vmatpush3.bf16.msra.mxu1 %v889_v15  ;;  %v95_v53 = vcombine.high %v77_v48, %v91_v49  ;;  %v94_v54 = vcombine.low %v77_v48, %v91_v49  ;;  %v929_v1 = vld [vmem:[#allocation2 + $0x8] ss:$14 sps:$4 sm:$0xff]   ;;  %v931_v2 = vld [vmem:[#allocation2 + $0xc] ss:$14 sps:$4 sm:$0x33]   ;;  %v922_v6 = vld [vmem:[#allocation5 + $0x168] sm:$0xff]  }
  0x3a   :  { %818 = vmatprep.subr.bf16.mxu1 %v892_v18  ;;  %v139_v50 = vpack.c.bf16 %v93_v45, %v93_v45  ;;  %v138_v51 = vpack.c.bf16 %v92_v46, %v92_v46  ;;  %v921_v3 = vld [vmem:[#allocation5 + $0x120] sm:$0xff]   ;;  %v934_v5 = vld [vmem:[#allocation2 + $0x28] ss:$14 sps:$4 sm:$0x33]   ;;  %v106_v7 = vrot.slane %v929_v1, %v1067_v36  ;;  %v113_v8 = vrot.slane %v931_v2, %v1067_v36  ;;  %v923_v11 = vld [vmem:[#allocation5 + $0x128] sm:$0xff]  }
  0x3b   :  { %797 = vmatpush3.bf16.msra.mxu0 %v891_v17  ;;  %v141_v56 = vpack.c.bf16 %v95_v53, %v95_v53  ;;  %v140_v57 = vpack.c.bf16 %v94_v54, %v94_v54  ;;  %v127_v10 = vrot.slane %v934_v5, %v1067_v36  ;;  %v924_v14 = vld [vmem:[#allocation5 + $0x170] sm:$0xff]   ;;  %v926_v18 = vld [vmem:[#allocation5 + $0x178] sm:$0xff]   ;;  %v737_v23 = vld [vmem:[%s1094_s2] ss:$0 sm:$0xff] }
  0x3c   :  { %798 = vmatprep.subr.bf16.mxu0 %v894_v20  ;;  %580 = vmatprep.mubr.bf16.mxu0 %v139_v50  ;;  %v129_v12 = vcombine.high %v106_v7, %v120_v9  ;;  %v925_v17 = vld [vmem:[#allocation5 + $0x130] sm:$0xff]   ;;  %v927_v20 = vld [vmem:[#allocation5 + $0x138] sm:$0xff]  }
  0x3d   :  { %819 = vmatpush3.bf16.msra.mxu1 %v893_v19  ;;  %620 = vmatprep.mubr.bf16.mxu1 %v141_v56  ;;  %v130_v13 = vcombine.low %v113_v8, %v127_v10  ;;  %v128_v19 = vcombine.low %v106_v7, %v120_v9 }
  0x3e   :  { %820 = vmatprep.subr.bf16.mxu1 %v896_v22  ;;  %v143_v15 = vpack.c.bf16 %v129_v12, %v129_v12 }
  0x3f   :  { %799 = vmatpush3.bf16.msra.mxu0 %v895_v21  ;;  %v144_v16 = vpack.c.bf16 %v130_v13, %v130_v13  ;;  %v142_v21 = vpack.c.bf16 %v128_v19, %v128_v19 }
  0x40   :  { %800 = vmatprep.subr.bf16.mxu0 %v898_v27 }
  0x41   :  { %821 = vmatpush3.bf16.msra.mxu1 %v897_v26 }
  0x42   :  { %822 = vmatprep.subr.bf16.mxu1 %v900_v29 }
  0x43   :  { %801 = vmatpush3.bf16.msra.mxu0 %v899_v28 }
  0x44   :  { %802 = vmatprep.subr.bf16.mxu0 %v902_v33 }
  0x45   :  { %823 = vmatpush3.bf16.msra.mxu1 %v901_v32 }
  0x46   :  { %824 = vmatprep.subr.bf16.mxu1 %v904_v35 }
  0x47   :  { %803 = vmatpush3.bf16.msra.mxu0 %v903_v34 }
  0x48   :  { %832 = vmatprep.subr.bf16.mxu0 %v910_v42 }
  0x49   :  { %825 = vmatpush3.bf16.msra.mxu1 %v909_v39 }
  0x4a   :  { %856 = vmatprep.subr.bf16.mxu1 %v1018_v47  ;;  %581 = vmatmul.mubr.bf16.vlgmr.msra.gmra.mrb[0].mxu0 %v138_v51 }
  0x4b   :  { %833 = vmatpush3.bf16.msra.mxu0 %v913_v52  ;;  %660 = vmatprep.mubr.bf16.mxu0 %v143_v15 }
  0x4c   :  { %834 = vmatprep.subr.bf16.mxu0 %v914_v55  ;;  %621 = vmatmul.mubr.bf16.vlgmr.msra.gmra.mrb[0].mxu1 %v140_v57 }
  0x4d   :  { %858 = vmatprep.mubr.msk.bf16.mxu1 %vm1019_vm0, %v1018_v47  ;;  %857 = vmatpush3.bf16.msra.mxu1 %v928_v0 }
  0x4f   :  { %835 = vmatpush3.bf16.msra.mxu0 %v915_v58 }
  0x50   :  { %836 = vmatprep.subr.bf16.mxu0 %v916_v59 }
  0x53   :  { %837 = vmatpush3.bf16.msra.mxu0 %v917_v60 }
  0x54   :  { %838 = vmatprep.subr.bf16.mxu0 %v918_v61  ;;  %859 = vmatmul.mubr.msk.bf16.vlgmr.msra.gmra.mrb[4].mxu1 %vm544_vm1, %v144_v16 }
  0x57   :  { %839 = vmatpush3.bf16.msra.mxu0 %v919_v62 }
  0x58   :  { %840 = vmatprep.subr.bf16.mxu0 %v920_v63 }
  0x5b   :  { %841 = vmatpush3.bf16.msra.mxu0 %v921_v3 }
  0x5c   :  { %842 = vmatprep.subr.bf16.mxu0 %v922_v6 }
  0x5f   :  { %843 = vmatpush3.bf16.msra.mxu0 %v923_v11 }
  0x60   :  { %844 = vmatprep.subr.bf16.mxu0 %v924_v14 }
  0x63   :  { %845 = vmatpush3.bf16.msra.mxu0 %v925_v17 }
  0x64   :  { %846 = vmatprep.subr.bf16.mxu0 %v926_v18 }
  0x67   :  { %847 = vmatpush3.bf16.msra.mxu0 %v927_v20 }
  0x6a   :  { %661 = vmatmul.mubr.bf16.vlgmr.msra.gmra.mrb[4].mxu0 %v142_v21 }
 0x11d   :  { %v804_v22 = vpop.f32.mrb[0].mxu0 }
 0x11e   :  { %v805_v24 = vpop.f32.mrb[1].mxu0 }
 0x11f   :  { %v806_v25 = vadd.f32 %v805_v24, %v804_v22  ;;  %v807_v26 = vpop.f32.mrb[2].mxu0  ;;  %v826_v27 = vpop.f32.mrb[0].mxu1 }
 0x120   :  { %v808_v28 = vpop.f32.mrb[3].mxu0  ;;  %v827_v30 = vpop.f32.mrb[1].mxu1 }
 0x121   :  { %v583_v29 = vadd.f32 %v806_v25, %v737_v23  ;;  %v828_v31 = vadd.f32 %v827_v30, %v826_v27  ;;  %v829_v32 = vpop.f32.mrb[2].mxu1 }
 0x122   :  { %v830_v33 = vpop.f32.mrb[3].mxu1 }
 0x123   :  { %v623_v34 = vadd.f32 %v828_v31, %v583_v29 }
 0x127   :  { %v702_v35 = vpop.f32.mrb[4].mxu1 }
 0x128   :  { %v860_v36 = vpop.f32.mrb[5].mxu1 }
 0x129   :  { %v705_v37 = vpop.f32.mrb[6].mxu1 }
 0x12a   :  { %v861_v38 = vpop.f32.mrb[7].mxu1 }
 0x13d   :  { %v848_v39 = vpop.f32.mrb[4].mxu0 }
 0x13e   :  { %v849_v40 = vpop.f32.mrb[5].mxu0 }
 0x13f   :  { %v850_v41 = vadd.f32 %v849_v40, %v848_v39  ;;  %v851_v42 = vpop.f32.mrb[6].mxu0 }
 0x140   :  { %v852_v43 = vpop.f32.mrb[7].mxu0 }
 0x141   :  { %v663_v44 = vadd.f32 %v850_v41, %v623_v34 }
 0x143   :  { %v703_v45 = vadd.f32 %v702_v35, %v663_v44 }
 0x145   :  { %708 = vmax.xlane.f32.xlu0 %v703_v45 }
 0x1d2   :  { %v709_v46 = vpop.xlane.xlu0 %708 }
 0x1d3   :  { %v710_v47 = vsub.f32 %v703_v45, %v709_v46 }
 0x1d5   :  { %v711_v48 = vmul.f32 1.442695, %v710_v47 }
 0x1d7   :  { %935 = vpow2.f32 %v711_v48 }
 0x1e1   :  { %v936_v49 = vpop.eup %935 }
 0x1e2   :  { %713 = vadd.xlane.f32.xlu0 %v936_v49 }
 0x26f   :  { %v714_v50 = vpop.xlane.xlu0 %713 }
 0x270   :  { %937 = vlog2.f32 %v714_v50 }
 0x27a   :  { %v938_v51 = vpop.eup %937 }
 0x27b   :  { %v716_v52 = vmul.f32 0.6931472, %v938_v51 }
 0x27d   :  { %v717_v53 = vsub.f32 %v710_v47, %v716_v52 }
 0x27f   :  { %718 = vst [vmem:[#allocation7] sm:$0xff] %v717_v53 }
 0x280   :  { %723 = vsyncadd [#allocation4], 96  ;;  %s1020_s2 = smov [#allocation7]  }
 0x281   :  { %s724_s14 = sshll.u32 %s1020_s2, 4  ;;  %s725_s14 = int_to_ptr.vmem [resolvable:$true] %s724_s14 }
 0x282   :  { %s983_s15 = scalar_lea.vmem %s725_s14, 32  ;;  %s987_s16 = scalar_lea.vmem %s725_s14, 128 }
 0x283   :  { %p984_p2 = scmp.ne.s32.totalorder %s725_s14, %s983_s15  ;;  %p988_p3 = scmp.lt.s32.totalorder %s725_s14, %s725_s14 }
 0x284   :  { %p989_p4 = scmp.lt.s32.totalorder %s987_s16, %s983_s15 }
 0x286   :  { %p990_p5 = por %p989_p4, %p988_p3 }
 0x288   :  { %p991_p6 = pnand %p990_p5, %p984_p2 }
 0x28a   :  { %994 = shalt.err (!%p991_p6)
}
 0x28b   :  { %s995_s19 = scalar_lea.hbm %s1095_s3, 32 }
 0x28c   :  { %p996_p7 = scmp.ne.s32.totalorder %s1095_s3, %s995_s19  ;;  %p999_p8 = scmp.lt.u32.totalorder %s995_s19, %s1095_s3 }
 0x28e   :  { %p1001_p9 = pnand %p999_p8, %p996_p7 }
 0x290   :  { %1004 = shalt.err (!%p1001_p9)
}
 0x291   :  { %s1021_s24 = smov 32   ;;  %s1022_s25 = smov 2  }
 0x292   :  { %730 = dma.vmem_to_hbm [thread:$0]  %s725_s14, 32, %s1095_s3, [#allocation4], %s1021_s24, %s1021_s24, %s1022_s25  }
 0x293   :  { %1009 = dma.done.wait [#allocation4], 128  }
 0x294   :  { %1010 = vsyncadd [#allocation4], 4294967168 }
 0x295   :  { %734 = vsyncpa [#allocation3], 1 }
 0x296   :  { %735 = vsyncpa [#allocation6], 1 }
 0x297   :  { %736 = vsyncpa [#allocation4], 1 }

</bundles_post_ra>
